<compile_context>
chip_gen: v7x
topology: tpu7x:2x2x1
jax: 0.10.0
libtpu: 0.0.40
codegen_flags: <defaults>
</compile_context>

<pallas_src>
import math
from functools import partial

import jax
import jax.numpy as jnp
from jax.experimental import pallas as pl
from jax.experimental.pallas import tpu as pltpu


def _gelu_tanh(x):
    # TODO(synk): PyTorch nn.GELU() defaults to the exact erf form; the tanh
    # approximation is used here (erf is not guaranteed to lower in Mosaic).
    c = math.sqrt(2.0 / math.pi)
    return 0.5 * x * (1.0 + jnp.tanh(c * (x + 0.044715 * (x * x * x))))


def decoder_kernel(x_ref, w1g_ref, b1_ref, w2t_ref, b2_ref,
                   w3bd_ref, b3_ref, wq_ref, bp_ref, o_ref):
    tb, nc = o_ref.shape
    m2_total = wq_ref.shape[0]

    # x_ref: (TB*M, S*C) slab for the current batch block (rows are b*M + m).
    x = x_ref[...]

    # conv_1 (1x1 over C) folded into one block-diagonal matmul:
    # (TB*M, S*C) @ (S*C, S)
    t1 = jnp.dot(x, w1g_ref[...], preferred_element_type=jnp.float32)
    t1 = _gelu_tanh(t1 + b1_ref[...])                      # (TB*M, S)

    # conv_2 (1x1 over S): (TB*M, S) @ (S, H)
    y2 = jnp.dot(t1, w2t_ref[...], preferred_element_type=jnp.float32)
    y2 = _gelu_tanh(y2 + b2_ref[...])                      # (TB*M, H)

    # conv_3 (1x1 over M, per batch element) as a single block-diagonal
    # left-multiply: (M2*TB, TB*M) @ (TB*M, H).  Output rows are ordered
    # m2-major / batch-minor, so the proj loop below slices contiguous rows.
    y3 = jnp.dot(w3bd_ref[...], y2, preferred_element_type=jnp.float32)
    y3 = _gelu_tanh(y3 + b3_ref[...])                      # (M2*TB, H)

    # proj: logits[b, nc] = bp[nc] + sum_{m2,h} y3[m2*TB+b, h] * wq[m2, h, nc]
    # wq is the PyTorch proj weight re-ordered wrapper-side so that no
    # in-kernel flatten/transpose of y3 is required.  M2 is small -> static
    # unrolled accumulation of (TB,H)@(H,NC) products over contiguous blocks.
    acc = jnp.zeros((tb, nc), jnp.float32)
    for m2 in range(m2_total):
        acc = acc + jnp.dot(y3[m2 * tb:(m2 + 1) * tb, :], wq_ref[m2],
                            preferred_element_type=jnp.float32)
    logits = acc + bp_ref[...]                             # (TB, NC)

    # numerically-stable softmax; divide goes to the EUP via approx reciprocal
    logits = logits - jnp.max(logits, axis=-1, keepdims=True)
    e = jnp.exp(logits)
    o_ref[...] = e * pl.reciprocal(jnp.sum(e, axis=-1, keepdims=True),
                                   approx=True)


@partial(jax.jit, static_argnames=("patch_sync", "patch_regional"))
def eegformer_decoder_forward(x, w1, b1, w2, b2, w3, b3, wp, bp,
                              *, patch_sync, patch_regional):
    """x: (B, features_m, patch_sync*patch_regional); weights in PyTorch layout."""
    B, M, SC = x.shape
    S, C = patch_sync, patch_regional
    assert SC == S * C
    H = w2.shape[0]                       # hidden_features
    M2 = w3.shape[0]                      # features_m // 2
    NC = wp.shape[0]                      # num_cls

    # ---- batch blocking: TB batch elements per grid step ----
    TB = min(B, 8)
    nblk = -(-B // TB)
    Bp = nblk * TB
    if Bp != B:
        x = jnp.concatenate(
            [x, jnp.zeros((Bp - B, M, SC), x.dtype)], axis=0)
    xf = x.reshape(Bp * M, SC)            # rows ordered b*M + m

    # ---- wrapper-side layout plumbing (pure XLA, outside the kernel) ----
    w1_vec = w1[0, :, 0]                                          # (C,)
    # block-diagonal weight so conv_1 becomes one (TB*M,S*C)@(S*C,S) matmul
    w1g = jnp.kron(jnp.eye(S, dtype=x.dtype), w1_vec.reshape(C, 1))  # (S*C, S)
    b1m = b1.reshape(1, 1)
    w2t = w2[:, :, 0].T                                           # (S, H)
    b2r = b2.reshape(1, H)
    w3m = w3[:, :, 0]                                             # (M2, M)
    # block-diagonal conv_3 weight: W3bd[m2*TB+b, b'*M+m] = delta(b,b') w3[m2,m]
    w3bd = jnp.einsum('bc,km->kbcm', jnp.eye(TB, dtype=x.dtype),
                      w3m).reshape(M2 * TB, TB * M)
    b3r = jnp.repeat(b3, TB).reshape(M2 * TB, 1)                  # (M2*TB, 1)
    # proj weight: Wp[nc, h*M2 + m2] -> Wq[m2, h, nc]
    wq = wp.reshape(NC, H, M2).transpose(2, 1, 0)                 # (M2, H, NC)
    bpr = bp.reshape(1, NC)

    out = pl.pallas_call(
        decoder_kernel,
        out_shape=jax.ShapeDtypeStruct((Bp, NC), jnp.float32),
        grid_spec=pltpu.PrefetchScalarGridSpec(
            num_scalar_prefetch=0,
            grid=(nblk,),
            in_specs=[
                pl.BlockSpec((TB * M, SC), lambda i: (i, 0)),        # x rows
                pl.BlockSpec((S * C, S), lambda i: (0, 0)),          # w1 (block-diag)
                pl.BlockSpec((1, 1), lambda i: (0, 0)),              # b1
                pl.BlockSpec((S, H), lambda i: (0, 0)),              # w2^T
                pl.BlockSpec((1, H), lambda i: (0, 0)),              # b2
                pl.BlockSpec((M2 * TB, TB * M), lambda i: (0, 0)),   # w3 (block-diag)
                pl.BlockSpec((M2 * TB, 1), lambda i: (0, 0)),        # b3 (repeated)
                pl.BlockSpec((M2, H, NC), lambda i: (0, 0, 0)),      # proj (reordered)
                pl.BlockSpec((1, NC), lambda i: (0, 0)),             # proj bias
            ],
            out_specs=pl.BlockSpec((TB, NC), lambda i: (i, 0)),
        ),
        compiler_params=pltpu.CompilerParams(
            dimension_semantics=("parallel",)),
    )(xf, w1g, b1m, w2t, b2r, w3bd, b3r, wq, bpr)
    return out[:B]


def eegformer_decoder_ref(x, w1, b1, w2, b2, w3, b3, wp, bp,
                          *, patch_sync, patch_regional):
    """Pure-JAX reference mirroring the PyTorch forward (same tanh GELU)."""
    B, M, SC = x.shape
    S, C = patch_sync, patch_regional
    H = w2.shape[0]
    M2 = w3.shape[0]
    xr = x.reshape(B, M, S, C)
    t1 = _gelu_tanh(jnp.einsum('bmsc,c->bms', xr, w1[0, :, 0]) + b1[0])   # (B,M,S)
    y2 = _gelu_tanh(jnp.einsum('bms,hs->bmh', t1, w2[:, :, 0]) + b2)      # (B,M,H)
    y3 = _gelu_tanh(jnp.einsum('bmh,km->bhk', y2, w3[:, :, 0]) + b3)      # (B,H,M2)
    logits = y3.reshape(B, H * M2) @ wp.T + bp
    return jax.nn.softmax(logits, axis=-1)


if __name__ == "__main__":
    # Small shapes consistent with the module:
    #   features_c = patch_regional = 4, features_s = patch_sync = 8,
    #   features_m = 16, hidden_features = 32, num_cls = 4.
    B = 2
    C = 4      # features_c == patch_regional
    S = 8      # features_s == patch_sync
    M = 16     # features_m
    H = 32     # hidden_features
    M2 = M // 2
    NC = 4     # num_cls

    key = jax.random.PRNGKey(0)
    kx, k1, k1b, k2, k2b, k3, k3b, kp, kpb = jax.random.split(key, 9)

    x = jax.random.normal(kx, (B, M, S * C), dtype=jnp.float32)

    # PyTorch-style parameter layouts + uniform init bounds (1/sqrt(fan_in)).
    b1_bnd = 1.0 / math.sqrt(C)
    b2_bnd = 1.0 / math.sqrt(S)
    b3_bnd = 1.0 / math.sqrt(M)
    bp_bnd = 1.0 / math.sqrt(M2 * H)
    w1 = jax.random.uniform(k1, (1, C, 1), jnp.float32, -b1_bnd, b1_bnd)
    b1 = jax.random.uniform(k1b, (1,), jnp.float32, -b1_bnd, b1_bnd)
    w2 = jax.random.uniform(k2, (H, S, 1), jnp.float32, -b2_bnd, b2_bnd)
    b2 = jax.random.uniform(k2b, (H,), jnp.float32, -b2_bnd, b2_bnd)
    w3 = jax.random.uniform(k3, (M2, M, 1), jnp.float32, -b3_bnd, b3_bnd)
    b3 = jax.random.uniform(k3b, (M2,), jnp.float32, -b3_bnd, b3_bnd)
    wp = jax.random.uniform(kp, (NC, M2 * H), jnp.float32, -bp_bnd, bp_bnd)
    bp = jax.random.uniform(kpb, (NC,), jnp.float32, -bp_bnd, bp_bnd)

    out = eegformer_decoder_forward(x, w1, b1, w2, b2, w3, b3, wp, bp,
                                    patch_sync=S, patch_regional=C)
    out = jax.block_until_ready(out)

    ref = eegformer_decoder_ref(x, w1, b1, w2, b2, w3, b3, wp, bp,
                                patch_sync=S, patch_regional=C)
    assert out.shape == (B, NC)
    assert jnp.allclose(out, ref, atol=1e-3, rtol=1e-3), (
        f"max abs err {jnp.max(jnp.abs(out - ref))}")

    print("KERNEL_OK")
</pallas_src>

<mosaic_0001>
module attributes {stable_mosaic.version = 11 : i64} {
  func.func @decoder_kernel(%arg0: i32, %arg1: memref<32x32xf32, #tpu.memory_space<vmem>>, %arg2: memref<32x8xf32, #tpu.memory_space<vmem>>, %arg3: memref<1x1xf32, #tpu.memory_space<vmem>>, %arg4: memref<8x32xf32, #tpu.memory_space<vmem>>, %arg5: memref<1x32xf32, #tpu.memory_space<vmem>>, %arg6: memref<16x32xf32, #tpu.memory_space<vmem>>, %arg7: memref<16x1xf32, #tpu.memory_space<vmem>>, %arg8: memref<8x32x4xf32, #tpu.memory_space<vmem>>, %arg9: memref<1x4xf32, #tpu.memory_space<vmem>>, %arg10: memref<2x4xf32, #tpu.memory_space<vmem>>) attributes {dimension_semantics = [#tpu.dimension_semantics<parallel>], iteration_bounds = array<i64: 1>, scalar_prefetch = 0 : i64, scratch_operands = 0 : i64, tpu.core_type = #tpu.core_type<tc>, window_params = [{transform_indices = @transform_0, window_bounds = array<i64: 32, 32>}, {pipeline_mode = #tpu.pipeline_mode<synchronous>, transform_indices = @transform_1, window_bounds = array<i64: 32, 8>}, {pipeline_mode = #tpu.pipeline_mode<synchronous>, transform_indices = @transform_2, window_bounds = array<i64: 1, 1>}, {pipeline_mode = #tpu.pipeline_mode<synchronous>, transform_indices = @transform_3, window_bounds = array<i64: 8, 32>}, {pipeline_mode = #tpu.pipeline_mode<synchronous>, transform_indices = @transform_4, window_bounds = array<i64: 1, 32>}, {pipeline_mode = #tpu.pipeline_mode<synchronous>, transform_indices = @transform_5, window_bounds = array<i64: 16, 32>}, {pipeline_mode = #tpu.pipeline_mode<synchronous>, transform_indices = @transform_6, window_bounds = array<i64: 16, 1>}, {pipeline_mode = #tpu.pipeline_mode<synchronous>, transform_indices = @transform_7, window_bounds = array<i64: 8, 32, 4>}, {pipeline_mode = #tpu.pipeline_mode<synchronous>, transform_indices = @transform_8, window_bounds = array<i64: 1, 4>}, {transform_indices = @transform_9, window_bounds = array<i64: 2, 4>}]} {
    %c0 = arith.constant 0 : index
    %c0_0 = arith.constant 0 : index
    %0 = vector.load %arg1[%c0, %c0_0] : memref<32x32xf32, #tpu.memory_space<vmem>>, vector<32x32xf32>
    %c0_1 = arith.constant 0 : index
    %c0_2 = arith.constant 0 : index
    %1 = vector.load %arg2[%c0_1, %c0_2] : memref<32x8xf32, #tpu.memory_space<vmem>>, vector<32x8xf32>
    %cst = arith.constant dense<0.000000e+00> : vector<32x8xf32>
    %2 = tpu.matmul %0, %1, %cst {dimension_numbers = #tpu.dot_dimension_numbers<[1], [0], [0], [1], [0, 0, 1, 1], [], []>} : vector<32x32xf32>, vector<32x8xf32>, vector<32x8xf32> -> vector<32x8xf32>
    %c0_3 = arith.constant 0 : index
    %c0_4 = arith.constant 0 : index
    %3 = vector.load %arg3[%c0_3, %c0_4] : memref<1x1xf32, #tpu.memory_space<vmem>>, vector<1x1xf32>
    %4 = vector.broadcast %3 : vector<1x1xf32> to vector<32x8xf32>
    %5 = arith.addf %2, %4 : vector<32x8xf32>
    %cst_5 = arith.constant 5.000000e-01 : f32
    %6 = vector.broadcast %cst_5 : f32 to vector<32x8xf32>
    %7 = arith.mulf %6, %5 : vector<32x8xf32>
    %8 = arith.mulf %5, %5 : vector<32x8xf32>
    %9 = arith.mulf %8, %5 : vector<32x8xf32>
    %cst_6 = arith.constant 4.471500e-02 : f32
    %10 = vector.broadcast %cst_6 : f32 to vector<32x8xf32>
    %11 = arith.mulf %10, %9 : vector<32x8xf32>
    %12 = arith.addf %5, %11 : vector<32x8xf32>
    %cst_7 = arith.constant 0.797884583 : f32
    %13 = vector.broadcast %cst_7 : f32 to vector<32x8xf32>
    %14 = arith.mulf %13, %12 : vector<32x8xf32>
    %15 = math.tanh %14 : vector<32x8xf32>
    %cst_8 = arith.constant 1.000000e+00 : f32
    %16 = vector.broadcast %cst_8 : f32 to vector<32x8xf32>
    %17 = arith.addf %16, %15 : vector<32x8xf32>
    %18 = arith.mulf %7, %17 : vector<32x8xf32>
    %c0_9 = arith.constant 0 : index
    %c0_10 = arith.constant 0 : index
    %19 = vector.load %arg4[%c0_9, %c0_10] : memref<8x32xf32, #tpu.memory_space<vmem>>, vector<8x32xf32>
    %cst_11 = arith.constant dense<0.000000e+00> : vector<32x32xf32>
    %20 = tpu.matmul %18, %19, %cst_11 {dimension_numbers = #tpu.dot_dimension_numbers<[1], [0], [0], [1], [0, 0, 1, 1], [], []>} : vector<32x8xf32>, vector<8x32xf32>, vector<32x32xf32> -> vector<32x32xf32>
    %c0_12 = arith.constant 0 : index
    %c0_13 = arith.constant 0 : index
    %21 = vector.load %arg5[%c0_12, %c0_13] : memref<1x32xf32, #tpu.memory_space<vmem>>, vector<1x32xf32>
    %22 = vector.broadcast %21 : vector<1x32xf32> to vector<32x32xf32>
    %23 = arith.addf %20, %22 : vector<32x32xf32>
    %cst_14 = arith.constant 5.000000e-01 : f32
    %24 = vector.broadcast %cst_14 : f32 to vector<32x32xf32>
    %25 = arith.mulf %24, %23 : vector<32x32xf32>
    %26 = arith.mulf %23, %23 : vector<32x32xf32>
    %27 = arith.mulf %26, %23 : vector<32x32xf32>
    %cst_15 = arith.constant 4.471500e-02 : f32
    %28 = vector.broadcast %cst_15 : f32 to vector<32x32xf32>
    %29 = arith.mulf %28, %27 : vector<32x32xf32>
    %30 = arith.addf %23, %29 : vector<32x32xf32>
    %cst_16 = arith.constant 0.797884583 : f32
    %31 = vector.broadcast %cst_16 : f32 to vector<32x32xf32>
    %32 = arith.mulf %31, %30 : vector<32x32xf32>
    %33 = math.tanh %32 : vector<32x32xf32>
    %cst_17 = arith.constant 1.000000e+00 : f32
    %34 = vector.broadcast %cst_17 : f32 to vector<32x32xf32>
    %35 = arith.addf %34, %33 : vector<32x32xf32>
    %36 = arith.mulf %25, %35 : vector<32x32xf32>
    %c0_18 = arith.constant 0 : index
    %c0_19 = arith.constant 0 : index
    %37 = vector.load %arg6[%c0_18, %c0_19] : memref<16x32xf32, #tpu.memory_space<vmem>>, vector<16x32xf32>
    %cst_20 = arith.constant dense<0.000000e+00> : vector<16x32xf32>
    %38 = tpu.matmul %37, %36, %cst_20 {dimension_numbers = #tpu.dot_dimension_numbers<[1], [0], [0], [1], [0, 0, 1, 1], [], []>} : vector<16x32xf32>, vector<32x32xf32>, vector<16x32xf32> -> vector<16x32xf32>
    %c0_21 = arith.constant 0 : index
    %c0_22 = arith.constant 0 : index
    %39 = vector.load %arg7[%c0_21, %c0_22] : memref<16x1xf32, #tpu.memory_space<vmem>>, vector<16x1xf32>
    %40 = vector.broadcast %39 : vector<16x1xf32> to vector<16x32xf32>
    %41 = arith.addf %38, %40 : vector<16x32xf32>
    %cst_23 = arith.constant 5.000000e-01 : f32
    %42 = vector.broadcast %cst_23 : f32 to vector<16x32xf32>
    %43 = arith.mulf %42, %41 : vector<16x32xf32>
    %44 = arith.mulf %41, %41 : vector<16x32xf32>
    %45 = arith.mulf %44, %41 : vector<16x32xf32>
    %cst_24 = arith.constant 4.471500e-02 : f32
    %46 = vector.broadcast %cst_24 : f32 to vector<16x32xf32>
    %47 = arith.mulf %46, %45 : vector<16x32xf32>
    %48 = arith.addf %41, %47 : vector<16x32xf32>
    %cst_25 = arith.constant 0.797884583 : f32
    %49 = vector.broadcast %cst_25 : f32 to vector<16x32xf32>
    %50 = arith.mulf %49, %48 : vector<16x32xf32>
    %51 = math.tanh %50 : vector<16x32xf32>
    %cst_26 = arith.constant 1.000000e+00 : f32
    %52 = vector.broadcast %cst_26 : f32 to vector<16x32xf32>
    %53 = arith.addf %52, %51 : vector<16x32xf32>
    %54 = arith.mulf %43, %53 : vector<16x32xf32>
    %cst_27 = arith.constant 0.000000e+00 : f32
    %55 = vector.broadcast %cst_27 : f32 to vector<2x4xf32>
    %56 = vector.extract_strided_slice %54 {offsets = [0, 0], sizes = [2, 32], strides = [1, 1]} : vector<16x32xf32> to vector<2x32xf32>
    %c0_28 = arith.constant 0 : index
    %c0_29 = arith.constant 0 : index
    %c0_30 = arith.constant 0 : index
    %57 = vector.load %arg8[%c0_28, %c0_29, %c0_30] : memref<8x32x4xf32, #tpu.memory_space<vmem>>, vector<1x32x4xf32>
    %58 = vector.shape_cast %57 : vector<1x32x4xf32> to vector<32x4xf32>
    %cst_31 = arith.constant dense<0.000000e+00> : vector<2x4xf32>
    %59 = tpu.matmul %56, %58, %cst_31 {dimension_numbers = #tpu.dot_dimension_numbers<[1], [0], [0], [1], [0, 0, 1, 1], [], []>} : vector<2x32xf32>, vector<32x4xf32>, vector<2x4xf32> -> vector<2x4xf32>
    %60 = arith.addf %55, %59 : vector<2x4xf32>
    %61 = vector.extract_strided_slice %54 {offsets = [2, 0], sizes = [2, 32], strides = [1, 1]} : vector<16x32xf32> to vector<2x32xf32>
    %c1 = arith.constant 1 : index
    %c0_32 = arith.constant 0 : index
    %c0_33 = arith.constant 0 : index
    %62 = vector.load %arg8[%c1, %c0_32, %c0_33] : memref<8x32x4xf32, #tpu.memory_space<vmem>>, vector<1x32x4xf32>
    %63 = vector.shape_cast %62 : vector<1x32x4xf32> to vector<32x4xf32>
    %cst_34 = arith.constant dense<0.000000e+00> : vector<2x4xf32>
    %64 = tpu.matmul %61, %63, %cst_34 {dimension_numbers = #tpu.dot_dimension_numbers<[1], [0], [0], [1], [0, 0, 1, 1], [], []>} : vector<2x32xf32>, vector<32x4xf32>, vector<2x4xf32> -> vector<2x4xf32>
    %65 = arith.addf %60, %64 : vector<2x4xf32>
    %66 = vector.extract_strided_slice %54 {offsets = [4, 0], sizes = [2, 32], strides = [1, 1]} : vector<16x32xf32> to vector<2x32xf32>
    %c2 = arith.constant 2 : index
    %c0_35 = arith.constant 0 : index
    %c0_36 = arith.constant 0 : index
    %67 = vector.load %arg8[%c2, %c0_35, %c0_36] : memref<8x32x4xf32, #tpu.memory_space<vmem>>, vector<1x32x4xf32>
    %68 = vector.shape_cast %67 : vector<1x32x4xf32> to vector<32x4xf32>
    %cst_37 = arith.constant dense<0.000000e+00> : vector<2x4xf32>
    %69 = tpu.matmul %66, %68, %cst_37 {dimension_numbers = #tpu.dot_dimension_numbers<[1], [0], [0], [1], [0, 0, 1, 1], [], []>} : vector<2x32xf32>, vector<32x4xf32>, vector<2x4xf32> -> vector<2x4xf32>
    %70 = arith.addf %65, %69 : vector<2x4xf32>
    %71 = vector.extract_strided_slice %54 {offsets = [6, 0], sizes = [2, 32], strides = [1, 1]} : vector<16x32xf32> to vector<2x32xf32>
    %c3 = arith.constant 3 : index
    %c0_38 = arith.constant 0 : index
    %c0_39 = arith.constant 0 : index
    %72 = vector.load %arg8[%c3, %c0_38, %c0_39] : memref<8x32x4xf32, #tpu.memory_space<vmem>>, vector<1x32x4xf32>
    %73 = vector.shape_cast %72 : vector<1x32x4xf32> to vector<32x4xf32>
    %cst_40 = arith.constant dense<0.000000e+00> : vector<2x4xf32>
    %74 = tpu.matmul %71, %73, %cst_40 {dimension_numbers = #tpu.dot_dimension_numbers<[1], [0], [0], [1], [0, 0, 1, 1], [], []>} : vector<2x32xf32>, vector<32x4xf32>, vector<2x4xf32> -> vector<2x4xf32>
    %75 = arith.addf %70, %74 : vector<2x4xf32>
    %76 = vector.extract_strided_slice %54 {offsets = [8, 0], sizes = [2, 32], strides = [1, 1]} : vector<16x32xf32> to vector<2x32xf32>
    %c4 = arith.constant 4 : index
    %c0_41 = arith.constant 0 : index
    %c0_42 = arith.constant 0 : index
    %77 = vector.load %arg8[%c4, %c0_41, %c0_42] : memref<8x32x4xf32, #tpu.memory_space<vmem>>, vector<1x32x4xf32>
    %78 = vector.shape_cast %77 : vector<1x32x4xf32> to vector<32x4xf32>
    %cst_43 = arith.constant dense<0.000000e+00> : vector<2x4xf32>
    %79 = tpu.matmul %76, %78, %cst_43 {dimension_numbers = #tpu.dot_dimension_numbers<[1], [0], [0], [1], [0, 0, 1, 1], [], []>} : vector<2x32xf32>, vector<32x4xf32>, vector<2x4xf32> -> vector<2x4xf32>
    %80 = arith.addf %75, %79 : vector<2x4xf32>
    %81 = vector.extract_strided_slice %54 {offsets = [10, 0], sizes = [2, 32], strides = [1, 1]} : vector<16x32xf32> to vector<2x32xf32>
    %c5 = arith.constant 5 : index
    %c0_44 = arith.constant 0 : index
    %c0_45 = arith.constant 0 : index
    %82 = vector.load %arg8[%c5, %c0_44, %c0_45] : memref<8x32x4xf32, #tpu.memory_space<vmem>>, vector<1x32x4xf32>
    %83 = vector.shape_cast %82 : vector<1x32x4xf32> to vector<32x4xf32>
    %cst_46 = arith.constant dense<0.000000e+00> : vector<2x4xf32>
    %84 = tpu.matmul %81, %83, %cst_46 {dimension_numbers = #tpu.dot_dimension_numbers<[1], [0], [0], [1], [0, 0, 1, 1], [], []>} : vector<2x32xf32>, vector<32x4xf32>, vector<2x4xf32> -> vector<2x4xf32>
    %85 = arith.addf %80, %84 : vector<2x4xf32>
    %86 = vector.extract_strided_slice %54 {offsets = [12, 0], sizes = [2, 32], strides = [1, 1]} : vector<16x32xf32> to vector<2x32xf32>
    %c6 = arith.constant 6 : index
    %c0_47 = arith.constant 0 : index
    %c0_48 = arith.constant 0 : index
    %87 = vector.load %arg8[%c6, %c0_47, %c0_48] : memref<8x32x4xf32, #tpu.memory_space<vmem>>, vector<1x32x4xf32>
    %88 = vector.shape_cast %87 : vector<1x32x4xf32> to vector<32x4xf32>
    %cst_49 = arith.constant dense<0.000000e+00> : vector<2x4xf32>
    %89 = tpu.matmul %86, %88, %cst_49 {dimension_numbers = #tpu.dot_dimension_numbers<[1], [0], [0], [1], [0, 0, 1, 1], [], []>} : vector<2x32xf32>, vector<32x4xf32>, vector<2x4xf32> -> vector<2x4xf32>
    %90 = arith.addf %85, %89 : vector<2x4xf32>
    %91 = vector.extract_strided_slice %54 {offsets = [14, 0], sizes = [2, 32], strides = [1, 1]} : vector<16x32xf32> to vector<2x32xf32>
    %c7 = arith.constant 7 : index
    %c0_50 = arith.constant 0 : index
    %c0_51 = arith.constant 0 : index
    %92 = vector.load %arg8[%c7, %c0_50, %c0_51] : memref<8x32x4xf32, #tpu.memory_space<vmem>>, vector<1x32x4xf32>
    %93 = vector.shape_cast %92 : vector<1x32x4xf32> to vector<32x4xf32>
    %cst_52 = arith.constant dense<0.000000e+00> : vector<2x4xf32>
    %94 = tpu.matmul %91, %93, %cst_52 {dimension_numbers = #tpu.dot_dimension_numbers<[1], [0], [0], [1], [0, 0, 1, 1], [], []>} : vector<2x32xf32>, vector<32x4xf32>, vector<2x4xf32> -> vector<2x4xf32>
    %95 = arith.addf %90, %94 : vector<2x4xf32>
    %c0_53 = arith.constant 0 : index
    %c0_54 = arith.constant 0 : index
    %96 = vector.load %arg9[%c0_53, %c0_54] : memref<1x4xf32, #tpu.memory_space<vmem>>, vector<1x4xf32>
    %97 = vector.broadcast %96 : vector<1x4xf32> to vector<2x4xf32>
    %98 = arith.addf %95, %97 : vector<2x4xf32>
    %cst_55 = arith.constant dense<0xFF800000> : vector<2xf32>
    %99 = vector.multi_reduction <maximumf>, %98, %cst_55 [1] : vector<2x4xf32> to vector<2xf32>
    %100 = vector.shape_cast %99 : vector<2xf32> to vector<2x1xf32>
    %101 = vector.broadcast %100 : vector<2x1xf32> to vector<2x4xf32>
    %102 = arith.subf %98, %101 : vector<2x4xf32>
    %103 = math.exp %102 : vector<2x4xf32>
    %cst_56 = arith.constant dense<0.000000e+00> : vector<2xf32>
    %104 = vector.multi_reduction <add>, %103, %cst_56 [1] : vector<2x4xf32> to vector<2xf32>
    %105 = vector.shape_cast %104 : vector<2xf32> to vector<2x1xf32>
    %106 = tpu.reciprocal %105 {approx = true} : vector<2x1xf32> -> vector<2x1xf32>
    %107 = vector.broadcast %106 : vector<2x1xf32> to vector<2x4xf32>
    %108 = arith.mulf %103, %107 : vector<2x4xf32>
    %c0_57 = arith.constant 0 : index
    %c0_58 = arith.constant 0 : index
    %109 = vector.load %arg10[%c0_57, %c0_58] : memref<2x4xf32, #tpu.memory_space<vmem>>, vector<2x4xf32>
    tpu.vector_store %arg10[%c0_57, %c0_58], %108 {strides = array<i32>} : memref<2x4xf32, #tpu.memory_space<vmem>>, vector<2x4xf32>,
    return
  }
  func.func @transform_0(%arg0: i32) -> (i32, i32) {
    %c0_i32 = arith.constant 0 : i32
    %c0_i32_0 = arith.constant 0 : i32
    return %arg0, %c0_i32 : i32, i32
  }
  func.func @transform_1(%arg0: i32) -> (i32, i32) {
    %c0_i32 = arith.constant 0 : i32
    %c0_i32_0 = arith.constant 0 : i32
    %c0_i32_1 = arith.constant 0 : i32
    return %c0_i32, %c0_i32_0 : i32, i32
  }
  func.func @transform_2(%arg0: i32) -> (i32, i32) {
    %c0_i32 = arith.constant 0 : i32
    %c0_i32_0 = arith.constant 0 : i32
    %c0_i32_1 = arith.constant 0 : i32
    return %c0_i32, %c0_i32_0 : i32, i32
  }
  func.func @transform_3(%arg0: i32) -> (i32, i32) {
    %c0_i32 = arith.constant 0 : i32
    %c0_i32_0 = arith.constant 0 : i32
    %c0_i32_1 = arith.constant 0 : i32
    return %c0_i32, %c0_i32_0 : i32, i32
  }
  func.func @transform_4(%arg0: i32) -> (i32, i32) {
    %c0_i32 = arith.constant 0 : i32
    %c0_i32_0 = arith.constant 0 : i32
    %c0_i32_1 = arith.constant 0 : i32
    return %c0_i32, %c0_i32_0 : i32, i32
  }
  func.func @transform_5(%arg0: i32) -> (i32, i32) {
    %c0_i32 = arith.constant 0 : i32
    %c0_i32_0 = arith.constant 0 : i32
    %c0_i32_1 = arith.constant 0 : i32
    return %c0_i32, %c0_i32_0 : i32, i32
  }
  func.func @transform_6(%arg0: i32) -> (i32, i32) {
    %c0_i32 = arith.constant 0 : i32
    %c0_i32_0 = arith.constant 0 : i32
    %c0_i32_1 = arith.constant 0 : i32
    return %c0_i32, %c0_i32_0 : i32, i32
  }
  func.func @transform_7(%arg0: i32) -> (i32, i32, i32) {
    %c0_i32 = arith.constant 0 : i32
    %c0_i32_0 = arith.constant 0 : i32
    %c0_i32_1 = arith.constant 0 : i32
    %c0_i32_2 = arith.constant 0 : i32
    return %c0_i32, %c0_i32_0, %c0_i32_1 : i32, i32, i32
  }
  func.func @transform_8(%arg0: i32) -> (i32, i32) {
    %c0_i32 = arith.constant 0 : i32
    %c0_i32_0 = arith.constant 0 : i32
    %c0_i32_1 = arith.constant 0 : i32
    return %c0_i32, %c0_i32_0 : i32, i32
  }
  func.func @transform_9(%arg0: i32) -> (i32, i32) {
    %c0_i32 = arith.constant 0 : i32
    %c0_i32_0 = arith.constant 0 : i32
    return %arg0, %c0_i32 : i32, i32
  }
}

</mosaic_0001>

<bundles_post_ra>
// kernel: eegformer_decoder_forward.1
= control target key start
LH: loop header
LB: loop body
LE: loop exit
PB: predicated region body
PF: predicated region fallthrough
CT: control target
= control target key end

     0   :  { %s1714_s0 = inlined_call_operand.vmem [shape: f32[32,32], index: 0, kind: input, shape index: {}]   ;;  %s1715_s1 = inlined_call_operand.vmem [shape: f32[32,8], index: 1, kind: input, shape index: {}]   ;;  %s1716_s2 = inlined_call_operand.<no memory space> [shape: f32[1,1], index: 2, kind: input, shape index: {}]   ;;  %s1717_s3 = inlined_call_operand.vmem [shape: f32[8,32], index: 3, kind: input, shape index: {}]   ;;  %s1718_s4 = inlined_call_operand.vmem [shape: f32[1,32], index: 4, kind: input, shape index: {}]   ;;  %s1719_s5 = inlined_call_operand.vmem [shape: f32[16,32], index: 5, kind: input, shape index: {}]   ;;  %s1720_s6 = inlined_call_operand.vmem [shape: f32[16,1], index: 6, kind: input, shape index: {}]   ;;  %s1721_s7 = inlined_call_operand.vmem [shape: f32[8,32,4], index: 7, kind: input, shape index: {}]   ;;  %s1722_s8 = inlined_call_operand.vmem [shape: f32[1,4], index: 8, kind: input, shape index: {}]   ;;  %s1723_s9 = inlined_call_operand.hbm [shape: f32[2,4], index: 9, kind: output, shape index: {}]  }
   0x1   :  { %v14_v0 = vstv %s1716_s2 }
   0x2   :  { %15 = vst [vmem:[#allocation2] sm:$0x1] %v14_v0 }
   0x3   :  { %v39_v1 = vld [vmem:[%s1715_s1] sm:$0xff]  ;;  %v40_v2 = vld [vmem:[%s1715_s1 + $0x8] sm:$0xff]  ;;  %v41_v3 = vld [vmem:[%s1715_s1 + $0x10] sm:$0xff]  ;;  %vm53_vm0 = vcmask 261120   ;;  %v1454_v7 = vmov 0  }
   0x4   :  { %v1335_v4 = vpack.c.bf16 %v40_v2, %v39_v1  ;;  %v42_v5 = vld [vmem:[%s1715_s1 + $0x18] sm:$0xff]  ;;  %v35_v6 = vld [vmem:[%s1714_s0] sm:$0xff]  ;;  %1404 = vset.pattern.permute.xlu0 %v1454_v7  ;;  %1405 = vset.pattern.permute.xlu1 %v1454_v7 }
   0x5   :  { %v1339_v8 = vpack.c.bf16 %v42_v5, %v41_v3  ;;  %1222 = vmatprep.mubr.msk.f32.mxu0 %vm53_vm0, %v35_v6 }
   0x6   :  { %1336 = vmatprep.subr.bf16.mxu0 %v1335_v4 }
   0x9   :  { %v1106_v9 = vld [vmem:[#allocation2] ss:$0 sm:$0xff] }
   0xa   :  { %50 = vperm.xlu0 %1404, %v1106_v9  }
   0xb   :  { %16 = vsyncpa [#allocation4], 0  ;;  %1338 = vmatpush3.bf16.msra.mxu0 %v1335_v4  ;;  %v331_v10 = vld [vmem:[%s1720_s6] sm:$0xff]  ;;  %v36_v11 = vld [vmem:[%s1714_s0 + $0x8] sm:$0xff]  ;;  %vm195_vm1 = vcmask 64512   ;;  %vm1456_vm2 = vmmov 0  }
   0xc   :  { %1340 = vmatprep.subr.bf16.mxu0 %v1339_v8  ;;  %v37_v12 = vld [vmem:[%s1714_s0 + $0x10] sm:$0xff]  ;;  %v38_v13 = vld [vmem:[%s1714_s0 + $0x18] sm:$0xff]  ;;  %v187_v14 = vld [vmem:[%s1717_s3] sm:$0xff]  ;;  %vm1079_vm3 = vcmask 25600   ;;  %s1458_s19 = smov [#allocation3]  }
   0xd   :  { %1228 = vmatprep.subr.mxu1 %v187_v14  ;;  %v329_v60 = vld [vmem:[%s1719_s5] sm:$0xff]  ;;  %v332_v61 = vld [vmem:[%s1720_s6 + $0x8] sm:$0xff]  ;;  %s1098_s20 = sshll.u32 %s1458_s19, 4  ;;  %s1099_s20 = int_to_ptr.vmem [resolvable:$true] %s1098_s20 }
   0xe   :  { %335 = vperm.xlu0 %1404, %v331_v10   ;;  %1229 = vmatpush3.msra.mxu1 %v187_v14  ;;  %v1111_v62 = vld [vmem:[%s1718_s4] ss:$0 sm:$0xff]  ;;  %p1435_p1 = scmp.lt.s32.totalorder %s1099_s20, %s1099_s20 }
   0xf   :  { %1342 = vmatpush3.bf16.msra.mxu0 %v1339_v8  ;;  %340 = vperm.xlu1 %1405, %v332_v61  }
  0x12   :  { %1223 = vmatmul.mubr.msk.f32.vlgmr.msra.gmra.mrb[0].mxu0 %vm53_vm0, %v36_v11 }
  0x13   :  { %1225 = vmatprep.mubr.msk.f32.mxu0 %vm53_vm0, %v37_v12 }
  0x16   :  { %1226 = vmatmul.mubr.msk.f32.gmra.mrb[2].mxu0 %vm53_vm0, %v38_v13 }
  0x89   :  { %v51_v15 = vpop.permute.xlu0 %50 }
  0xe5   :  { %v1224_v16 = vpop.f32.mrb[0].mxu0 }
  0xe6   :  { %v138_v17 = vadd.f32 %v1224_v16, %v51_v15  ;;  %v132_v18 = vpop.f32.mrb[1].mxu0 }
  0xe7   :  { %v133_v19 = vadd.f32 %v132_v18, %v51_v15 }
  0xe8   :  { %v156_v20 = vmul.f32 %v138_v17, %v138_v17  ;;  %v152_v49 = vmul.f32 0.5, %v138_v17 }
  0xe9   :  { %v155_v21 = vmul.f32 %v133_v19, %v133_v19  ;;  %v1227_v22 = vpop.f32.mrb[2].mxu0  ;;  %v151_v47 = vmul.f32 0.5, %v133_v19 }
  0xea   :  { %v160_v23 = vmul.f32 %v156_v20, %v138_v17  ;;  %v148_v24 = vadd.f32 %v1227_v22, %v51_v15  ;;  %v142_v25 = vpop.f32.mrb[3].mxu0 }
  0xeb   :  { %v159_v26 = vmul.f32 %v155_v21, %v133_v19  ;;  %v143_v27 = vadd.f32 %v142_v25, %v51_v15 }
  0xec   :  { %v164_v28 = vmul.f32 0.044715, %v160_v23  ;;  %v158_v29 = vmul.f32 %v148_v24, %v148_v24  ;;  %v154_v57 = vmul.f32 0.5, %v148_v24 }
  0xed   :  { %v163_v30 = vmul.f32 0.044715, %v159_v26  ;;  %v157_v31 = vmul.f32 %v143_v27, %v143_v27  ;;  %v153_v55 = vmul.f32 0.5, %v143_v27 }
  0xee   :  { %v168_v32 = vadd.f32 %v164_v28, %v138_v17  ;;  %v162_v33 = vmul.f32 %v158_v29, %v148_v24 }
  0xef   :  { %v161_v34 = vmul.f32 %v157_v31, %v143_v27  ;;  %v167_v35 = vadd.f32 %v163_v30, %v133_v19 }
  0xf0   :  { %v172_v36 = vmul.f32 0.7978846, %v168_v32  ;;  %v166_v37 = vmul.f32 0.044715, %v162_v33 }
  0xf1   :  { %v165_v38 = vmul.f32 0.044715, %v161_v34  ;;  %v171_v39 = vmul.f32 0.7978846, %v167_v35 }
  0xf2   :  { %1406 = vtanh.f32 %v172_v36  ;;  %v170_v40 = vadd.f32 %v166_v37, %v148_v24 }
  0xf3   :  { %v169_v41 = vadd.f32 %v165_v38, %v143_v27  ;;  %1408 = vtanh.f32 %v171_v39 }
  0xf4   :  { %v174_v42 = vmul.f32 0.7978846, %v170_v40 }
  0xf5   :  { %v173_v43 = vmul.f32 0.7978846, %v169_v41 }
  0xf6   :  { %1410 = vtanh.f32 %v174_v42 }
  0xf7   :  { %1412 = vtanh.f32 %v173_v43 }
  0xfc   :  { %v1407_v44 = vpop.eup %1406 }
  0xfd   :  { %v1409_v45 = vpop.eup %1408  ;;  %v180_v46 = vadd.f32 1.0, %v1407_v44 }
  0xfe   :  { %v179_v48 = vadd.f32 1.0, %v1409_v45  ;;  %v330_v45 = vld [vmem:[%s1719_s5 + $0x8] sm:$0xff] }
  0xff   :  { %v184_v53 = vmul.f32 %v180_v46, %v152_v49  ;;  %v442_v46 = vld [vmem:[%s1721_s7] sm:$0xff]  ;;  %v1455_v49 = vmov 0.0|0.0  }
 0x100   :  { %v1411_v50 = vpop.eup %1410  ;;  %v183_v51 = vmul.f32 %v179_v48, %v151_v47  ;;  %v443_v47 = vld [vmem:[%s1721_s7 + $0x8] sm:$0xff]  ;;  %1351 = vmatprep.subr.bf16.mxu0 %v1455_v49 }
 0x101   :  { %v1413_v52 = vpop.eup %1412  ;;  %v182_v54 = vadd.f32 1.0, %v1411_v50  ;;  %v1358_v48 = vpack.c.bf16 %v443_v47, %v442_v46  ;;  %v1118_v50 = vld [vmem:[%s1721_s7 + $0x20] sm:$0xff]  ;;  %v1150_v47 = vld [vmem:[%s1721_s7 + $0xe8] sm:$0xff] }
 0x102   :  { %1230 = vmatprep.mubr.msk.f32.mxu1 %vm195_vm1, %v183_v51  ;;  %v181_v56 = vadd.f32 1.0, %v1413_v52  ;;  %v1119_v51 = vld [vmem:[%s1721_s7 + $0x28] sm:$0xff]  ;;  %v1149_v46 = vld [vmem:[%s1721_s7 + $0xe0] sm:$0xff] }
 0x103   :  { %1231 = vmatmul.mubr.msk.f32.vlgmr.msra.gmra.mrb[0].mxu1 %vm195_vm1, %v184_v53  ;;  %v186_v59 = vmul.f32 %v182_v54, %v154_v57  ;;  %v1352_v52 = vpack.c.bf16 %v1119_v51, %v1118_v50  ;;  %v444_v53 = vld [vmem:[%s1721_s7 + $0x10] sm:$0xff]  ;;  %v445_v54 = vld [vmem:[%s1721_s7 + $0x18] sm:$0xff]  ;;  %v1144_v50 = vld [vmem:[%s1721_s7 + $0xc0] sm:$0xff] }
 0x104   :  { %v185_v58 = vmul.f32 %v181_v56, %v153_v55  ;;  %v1361_v55 = vpack.c.bf16 %v445_v54, %v444_v53  ;;  %v1120_v56 = vld [vmem:[%s1721_s7 + $0x30] sm:$0xff]  ;;  %v1121_v57 = vld [vmem:[%s1721_s7 + $0x38] sm:$0xff]  ;;  %v1145_v51 = vld [vmem:[%s1721_s7 + $0xc8] sm:$0xff] }
 0x105   :  { %1353 = vmatpush3.bf16.msra.mxu0 %v1352_v52  ;;  %v1394_v52 = vpack.c.bf16 %v1150_v47, %v1149_v46  ;;  %v1151_v54 = vld [vmem:[%s1721_s7 + $0xf0] sm:$0xff] }
 0x106   :  { %1233 = vmatprep.mubr.msk.f32.mxu1 %vm195_vm1, %v185_v58  ;;  %1354 = vmatprep.subr.bf16.mxu0 %v1455_v49  ;;  %v1355_v58 = vpack.c.bf16 %v1121_v57, %v1120_v56  ;;  %v1388_v56 = vpack.c.bf16 %v1145_v51, %v1144_v50  ;;  %v1146_v57 = vld [vmem:[%s1721_s7 + $0xd0] sm:$0xff] }
 0x107   :  { %1234 = vmatmul.mubr.msk.f32.gmra.mrb[2].mxu1 %vm195_vm1, %v186_v59  ;;  %v1457_v59 = vmov 0.0  }
 0x108   :  { %1244 = vmatprep.mubr.msk.f32.mxu1 %vm53_vm0, %v329_v60  ;;  %1255 = vmatprep.mubr.msk.f32.mxu0 %vm1456_vm2, %v1457_v59  ;;  %v341_v60 = vpop.permute.xlu1 %340 }
 0x109   :  { %1356 = vmatpush3.bf16.msra.mxu0 %v1355_v58  ;;  %v1147_v58 = vld [vmem:[%s1721_s7 + $0xd8] sm:$0xff] }
 0x10a   :  { %1363 = vmatprep.subr.bf16.mxu0 %v1455_v49 }
 0x1d6   :  { %v1232_v63 = vpop.f32.mrb[0].mxu1 }
 0x1d7   :  { %v280_v0 = vadd.f32 %v1232_v63, %v1111_v62  ;;  %v274_v1 = vpop.f32.mrb[1].mxu1 }
 0x1d8   :  { %v275_v2 = vadd.f32 %v1111_v62, %v274_v1 }
 0x1d9   :  { %v298_v3 = vmul.f32 %v280_v0, %v280_v0  ;;  %v294_v29 = vmul.f32 0.5, %v280_v0 }
 0x1da   :  { %v297_v4 = vmul.f32 %v275_v2, %v275_v2  ;;  %v1235_v5 = vpop.f32.mrb[2].mxu1  ;;  %v293_v31 = vmul.f32 0.5, %v275_v2 }
 0x1db   :  { %v302_v6 = vmul.f32 %v298_v3, %v280_v0  ;;  %v290_v7 = vadd.f32 %v1235_v5, %v1111_v62  ;;  %v284_v8 = vpop.f32.mrb[3].mxu1 }
 0x1dc   :  { %v301_v9 = vmul.f32 %v297_v4, %v275_v2  ;;  %v285_v10 = vadd.f32 %v1111_v62, %v284_v8  ;;  %v336_v62 = vpop.permute.xlu0 %335 }
 0x1dd   :  { %v306_v11 = vmul.f32 0.044715, %v302_v6  ;;  %v300_v12 = vmul.f32 %v290_v7, %v290_v7  ;;  %v296_v37 = vmul.f32 0.5, %v290_v7 }
 0x1de   :  { %v305_v13 = vmul.f32 0.044715, %v301_v9  ;;  %v299_v14 = vmul.f32 %v285_v10, %v285_v10  ;;  %v295_v40 = vmul.f32 0.5, %v285_v10 }
 0x1df   :  { %v310_v15 = vadd.f32 %v306_v11, %v280_v0  ;;  %v304_v16 = vmul.f32 %v300_v12, %v290_v7  ;;  %v1129_v12 = vld [vmem:[%s1721_s7 + $0x60] sm:$0xff] }
 0x1e0   :  { %v309_v17 = vadd.f32 %v305_v13, %v275_v2  ;;  %v303_v18 = vmul.f32 %v299_v14, %v285_v10  ;;  %v1130_v13 = vld [vmem:[%s1721_s7 + $0x68] sm:$0xff] }
 0x1e1   :  { %v314_v19 = vmul.f32 0.7978846, %v310_v15  ;;  %v308_v20 = vmul.f32 0.044715, %v304_v16 }
 0x1e2   :  { %v313_v21 = vmul.f32 0.7978846, %v309_v17  ;;  %v307_v22 = vmul.f32 0.044715, %v303_v18  ;;  %v1124_v17 = vld [vmem:[%s1721_s7 + $0x40] sm:$0xff]  ;;  %v1125_v18 = vld [vmem:[%s1721_s7 + $0x48] sm:$0xff] }
 0x1e3   :  { %1414 = vtanh.f32 %v314_v19  ;;  %v312_v23 = vadd.f32 %v308_v20, %v290_v7  ;;  %v1370_v19 = vpack.c.bf16 %v1130_v13, %v1129_v12 }
 0x1e4   :  { %1416 = vtanh.f32 %v313_v21  ;;  %v311_v24 = vadd.f32 %v307_v22, %v285_v10  ;;  %v1131_v21 = vld [vmem:[%s1721_s7 + $0x70] sm:$0xff]  ;;  %v1132_v22 = vld [vmem:[%s1721_s7 + $0x78] sm:$0xff] }
 0x1e5   :  { %v316_v25 = vmul.f32 0.7978846, %v312_v23  ;;  %v1364_v23 = vpack.c.bf16 %v1125_v18, %v1124_v17 }
 0x1e6   :  { %v315_v26 = vmul.f32 0.7978846, %v311_v24 }
 0x1e7   :  { %1418 = vtanh.f32 %v316_v25  ;;  %v1126_v25 = vld [vmem:[%s1721_s7 + $0x50] sm:$0xff] }
 0x1e8   :  { %1420 = vtanh.f32 %v315_v26  ;;  %v1127_v26 = vld [vmem:[%s1721_s7 + $0x58] sm:$0xff] }
 0x1ed   :  { %v1415_v27 = vpop.eup %1414 }
 0x1ee   :  { %v1417_v28 = vpop.eup %1416  ;;  %v322_v30 = vadd.f32 1.0, %v1415_v27  ;;  %v1373_v27 = vpack.c.bf16 %v1132_v22, %v1131_v21 }
 0x1ef   :  { %v321_v32 = vadd.f32 1.0, %v1417_v28  ;;  %v1139_v28 = vld [vmem:[%s1721_s7 + $0xa0] sm:$0xff] }
 0x1f0   :  { %v326_v33 = vmul.f32 %v322_v30, %v294_v29  ;;  %v1140_v29 = vld [vmem:[%s1721_s7 + $0xa8] sm:$0xff] }
 0x1f1   :  { %v1419_v34 = vpop.eup %1418  ;;  %v325_v35 = vmul.f32 %v321_v32, %v293_v31  ;;  %v1367_v31 = vpack.c.bf16 %v1127_v26, %v1126_v25  ;;  %v1134_v32 = vld [vmem:[%s1721_s7 + $0x80] sm:$0xff] }
 0x1f2   :  { %v1421_v36 = vpop.eup %1420  ;;  %v324_v38 = vadd.f32 1.0, %v1419_v34  ;;  %v1382_v34 = vpack.c.bf16 %v1140_v29, %v1139_v28 }
 0x1f3   :  { %v1343_v39 = vpack.c.bf16 %v326_v33, %v325_v35  ;;  %v323_v41 = vadd.f32 1.0, %v1421_v36  ;;  %v1135_v33 = vld [vmem:[%s1721_s7 + $0x88] sm:$0xff] }
 0x1f4   :  { %v328_v42 = vmul.f32 %v324_v38, %v296_v37  ;;  %v1141_v37 = vld [vmem:[%s1721_s7 + $0xb0] sm:$0xff]  ;;  %v1142_v38 = vld [vmem:[%s1721_s7 + $0xb8] sm:$0xff] }
 0x1f5   :  { %1344 = vmatprep.subr.bf16.mxu1 %v1343_v39  ;;  %v327_v43 = vmul.f32 %v323_v41, %v295_v40 }
 0x1f6   :  { %1346 = vmatpush3.bf16.msra.mxu1 %v1343_v39  ;;  %v1376_v39 = vpack.c.bf16 %v1135_v33, %v1134_v32 }
 0x1f7   :  { %v1347_v44 = vpack.c.bf16 %v328_v42, %v327_v43  ;;  %v1136_v42 = vld [vmem:[%s1721_s7 + $0x90] sm:$0xff]  ;;  %v1137_v43 = vld [vmem:[%s1721_s7 + $0x98] sm:$0xff] }
 0x1f9   :  { %1348 = vmatprep.subr.bf16.mxu1 %v1347_v44 }
 0x1fa   :  { %1350 = vmatpush3.bf16.msra.mxu1 %v1347_v44  ;;  %v1385_v44 = vpack.c.bf16 %v1142_v38, %v1141_v37 }
 0x1fb   :  { %1357 = vmatprep.subr.bf16.mxu1 %v1455_v49 }
 0x1fd   :  { %1245 = vmatmul.mubr.msk.f32.vlgmr.msra.gmra.mrb[4].mxu1 %vm53_vm0, %v330_v45 }
 0x1fe   :  { %1359 = vmatpush3.bf16.msra.mxu1 %v1358_v48  ;;  %1266 = vmatprep.mubr.msk.f32.mxu1 %vm1456_vm2, %v1457_v59  ;;  %v1379_v48 = vpack.c.bf16 %v1137_v43, %v1136_v42 }
 0x1ff   :  { %1360 = vmatprep.subr.bf16.mxu1 %v1455_v49 }
 0x202   :  { %1362 = vmatpush3.bf16.msra.mxu1 %v1361_v55  ;;  %v1152_v55 = vld [vmem:[%s1721_s7 + $0xf8] sm:$0xff] }
 0x203   :  { %1369 = vmatprep.subr.bf16.mxu1 %v1455_v49 }
 0x2d0   :  { %v1246_v61 = vpop.f32.mrb[4].mxu1 }
 0x2d1   :  { %v421_v63 = vadd.f32 %v1246_v61, %v341_v60  ;;  %v415_v0 = vpop.f32.mrb[5].mxu1  ;;  %v1397_v60 = vpack.c.bf16 %v1152_v55, %v1151_v54  ;;  %v1391_v61 = vpack.c.bf16 %v1147_v58, %v1146_v57 }
 0x2d2   :  { %v416_v1 = vadd.f32 %v415_v0, %v336_v62 }
 0x2d3   :  { %v427_v2 = vmul.f32 %v421_v63, %v421_v63  ;;  %v425_v40 = vmul.f32 0.5, %v421_v63 }
 0x2d4   :  { %v426_v3 = vmul.f32 %v416_v1, %v416_v1  ;;  %v424_v15 = vmul.f32 0.5, %v416_v1 }
 0x2d5   :  { %v429_v4 = vmul.f32 %v427_v2, %v421_v63 }
 0x2d6   :  { %v428_v5 = vmul.f32 %v426_v3, %v416_v1 }
 0x2d7   :  { %v431_v7 = vmul.f32 0.044715, %v429_v4 }
 0x2d8   :  { %v430_v6 = vmul.f32 0.044715, %v428_v5 }
 0x2d9   :  { %v433_v10 = vadd.f32 %v431_v7, %v421_v63 }
 0x2da   :  { %v432_v8 = vadd.f32 %v430_v6, %v416_v1 }
 0x2db   :  { %v435_v11 = vmul.f32 0.7978846, %v433_v10 }
 0x2dc   :  { %v434_v9 = vmul.f32 0.7978846, %v432_v8 }
 0x2de   :  { %1422 = vtanh.f32 %v434_v9 }
 0x2df   :  { %1424 = vtanh.f32 %v435_v11 }
 0x2e8   :  { %v1423_v14 = vpop.eup %1422 }
 0x2e9   :  { %v438_v16 = vadd.f32 1.0, %v1423_v14  ;;  %v1425_v30 = vpop.eup %1424 }
 0x2ea   :  { %v439_v35 = vadd.f32 1.0, %v1425_v30 }
 0x2eb   :  { %v440_v20 = vmul.f32 %v438_v16, %v424_v15 }
 0x2ec   :  { %v441_v45 = vmul.f32 %v439_v35, %v425_v40 }
 0x2ed   :  { %1267 = vmatmul.mubr.msk.f32.vlgmr.msra.gmra.mrb[6].mxu1 %vm53_vm0, %v440_v20  ;;  %v452_v24 = vrot.slane %v440_v20, 2  ;;  %v681_v36 = vrot.slane %v440_v20, 6  ;;  %v602_v41 = vrot.slane %v440_v20, 4  ;;  %v1154_v20 = vld [vmem:[%s1722_s8] ss:$0 sm:$0xff]  ;;  %s1430_s8 = scalar_lea.vmem %s1099_s20, 32 }
 0x2ee   :  { %1371 = vmatpush3.bf16.msra.mxu1 %v1370_v19  ;;  %1288 = vmatprep.mubr.msk.f32.mxu1 %vm1456_vm2, %v1457_v59  ;;  %v839_v53 = vrot.slane %v441_v45, 2  ;;  %v997_v62 = vrot.slane %v441_v45, 6  ;;  %v918_v63 = vrot.slane %v441_v45, 4  ;;  %p1431_p0 = scmp.ne.s32.totalorder %s1099_s20, %s1430_s8  ;;  %p1436_p2 = scmp.lt.s32.totalorder %s1430_s8, %s1430_s8 }
 0x2ef   :  { %1256 = vmatmul.mubr.msk.f32.vlgmr.msra.gmra.mrb[4].mxu0 %vm53_vm0, %v452_v24  ;;  %1372 = vmatprep.subr.bf16.mxu1 %v1455_v49 }
 0x2f0   :  { %1365 = vmatpush3.bf16.msra.mxu0 %v1364_v23  ;;  %1277 = vmatprep.mubr.msk.f32.mxu0 %vm1456_vm2, %v1457_v59  ;;  %p1437_p3 = por %p1436_p2, %p1435_p1 }
 0x2f1   :  { %1366 = vmatprep.subr.bf16.mxu0 %v1455_v49 }
 0x2f2   :  { %1374 = vmatpush3.bf16.msra.mxu1 %v1373_v27  ;;  %p1438_p4 = pnand %p1437_p3, %p1431_p0 }
 0x2f3   :  { %1381 = vmatprep.subr.bf16.mxu1 %v1455_v49 }
 0x2f4   :  { %1368 = vmatpush3.bf16.msra.mxu0 %v1367_v31 }
 0x2f5   :  { %1289 = vmatmul.mubr.msk.f32.vlgmr.msra.gmra.mrb[8].mxu1 %vm53_vm0, %v681_v36  ;;  %1375 = vmatprep.subr.bf16.mxu0 %v1455_v49 }
 0x2f6   :  { %1383 = vmatpush3.bf16.msra.mxu1 %v1382_v34  ;;  %1310 = vmatprep.mubr.msk.f32.mxu1 %vm1456_vm2, %v1457_v59 }
 0x2f7   :  { %1278 = vmatmul.mubr.msk.f32.vlgmr.msra.gmra.mrb[6].mxu0 %vm53_vm0, %v602_v41  ;;  %1384 = vmatprep.subr.bf16.mxu1 %v1455_v49 }
 0x2f8   :  { %1377 = vmatpush3.bf16.msra.mxu0 %v1376_v39  ;;  %1299 = vmatprep.mubr.msk.f32.mxu0 %vm1456_vm2, %v1457_v59 }
 0x2f9   :  { %1378 = vmatprep.subr.bf16.mxu0 %v1455_v49 }
 0x2fa   :  { %1386 = vmatpush3.bf16.msra.mxu1 %v1385_v44 }
 0x2fb   :  { %1393 = vmatprep.subr.bf16.mxu1 %v1455_v49 }
 0x2fc   :  { %1380 = vmatpush3.bf16.msra.mxu0 %v1379_v48 }
 0x2fd   :  { %1311 = vmatmul.mubr.msk.f32.vlgmr.msra.gmra.mrb[10].mxu1 %vm53_vm0, %v839_v53  ;;  %1387 = vmatprep.subr.bf16.mxu0 %v1455_v49 }
 0x2fe   :  { %1395 = vmatpush3.bf16.msra.mxu1 %v1394_v52  ;;  %1332 = vmatprep.mubr.msk.f32.mxu1 %vm1456_vm2, %v1457_v59 }
 0x2ff   :  { %1300 = vmatmul.mubr.msk.f32.vlgmr.msra.gmra.mrb[8].mxu0 %vm53_vm0, %v441_v45  ;;  %1396 = vmatprep.subr.bf16.mxu1 %v1455_v49 }
 0x300   :  { %1389 = vmatpush3.bf16.msra.mxu0 %v1388_v56  ;;  %1321 = vmatprep.mubr.msk.f32.mxu0 %vm1456_vm2, %v1457_v59 }
 0x301   :  { %1390 = vmatprep.subr.bf16.mxu0 %v1455_v49 }
 0x302   :  { %1398 = vmatpush3.bf16.msra.mxu1 %v1397_v60 }
 0x304   :  { %1392 = vmatpush3.bf16.msra.mxu0 %v1391_v61 }
 0x305   :  { %1333 = vmatmul.mubr.msk.f32.vlgmr.msra.gmra.mrb[12].mxu1 %vm53_vm0, %v997_v62 }
 0x307   :  { %1322 = vmatmul.mubr.msk.f32.vlgmr.msra.gmra.mrb[10].mxu0 %vm53_vm0, %v918_v63 }
 0x3c0   :  { %v593_v0 = vpop.f32.mrb[6].mxu1 }
 0x3c1   :  { %v1268_v1 = vpop.f32.mrb[7].mxu1 }
 0x3c2   :  { %v521_v2 = vpop.f32.mrb[4].mxu0 }
 0x3c3   :  { %v594_v3 = vadd.f32 %v593_v0, %v521_v2  ;;  %v1257_v4 = vpop.f32.mrb[5].mxu0 }
 0x3c8   :  { %v750_v5 = vpop.f32.mrb[8].mxu1 }
 0x3c9   :  { %v1290_v6 = vpop.f32.mrb[9].mxu1 }
 0x3ca   :  { %v671_v7 = vpop.f32.mrb[6].mxu0 }
 0x3cb   :  { %v675_v8 = vadd.f32 %v671_v7, %v594_v3  ;;  %v1279_v59 = vpop.f32.mrb[7].mxu0 }
 0x3cd   :  { %v754_v9 = vadd.f32 %v750_v5, %v675_v8 }
 0x3d0   :  { %v908_v49 = vpop.f32.mrb[10].mxu1 }
 0x3d1   :  { %v1312_v10 = vpop.f32.mrb[11].mxu1 }
 0x3d2   :  { %v829_v11 = vpop.f32.mrb[8].mxu0 }
 0x3d3   :  { %v833_v12 = vadd.f32 %v829_v11, %v754_v9  ;;  %v1301_v13 = vpop.f32.mrb[9].mxu0 }
 0x3d5   :  { %v912_v14 = vadd.f32 %v908_v49, %v833_v12 }
 0x3d8   :  { %v1066_v15 = vpop.f32.mrb[12].mxu1 }
 0x3d9   :  { %v1334_v16 = vpop.f32.mrb[13].mxu1 }
 0x3da   :  { %v987_v17 = vpop.f32.mrb[10].mxu0 }
 0x3db   :  { %v991_v18 = vadd.f32 %v987_v17, %v912_v14  ;;  %v1323_v19 = vpop.f32.mrb[11].mxu0 }
 0x3dd   :  { %v1070_v21 = vadd.f32 %v1066_v15, %v991_v18 }
 0x3df   :  { %v1078_v22 = vadd.f32 %v1154_v20, %v1070_v21 }
 0x3e1   :  { %v1080_v23 = vsel %vm1079_vm3, %v1078_v22, -inf }
 0x3e2   :  { %1081 = vmax.xlane.f32.xlu1 %v1080_v23 }
 0x46f   :  { %v1082_v24 = vpop.xlane.xlu1 %1081 }
 0x470   :  { %v1083_v25 = vsub.f32 %v1078_v22, %v1082_v24 }
 0x472   :  { %v1084_v26 = vmul.f32 1.442695, %v1083_v25 }
 0x474   :  { %1426 = vpow2.f32 %v1084_v26 }
 0x47e   :  { %v1427_v27 = vpop.eup %1426 }
 0x47f   :  { %v1086_v28 = vsel %vm1079_vm3, %v1427_v27, 0.0 }
 0x480   :  { %1087 = vadd.xlane.f32.xlu0 %v1086_v28 }
 0x50d   :  { %v1088_v29 = vpop.xlane.xlu0 %1087 }
 0x50e   :  { %1428 = vrcp.f32 %v1088_v29 }
 0x518   :  { %v1429_v30 = vpop.eup %1428 }
 0x519   :  { %v1090_v31 = vmul.f32 %v1429_v30, %v1427_v27 }
 0x51b   :  { %1091 = vst.msk [vmem:[#allocation3] sm:$0x3] %vm1079_vm3, %v1090_v31 }
 0x51c   :  { %1441 = shalt.err (!%p1438_p4)
}
 0x51d   :  { %s1442_s22 = scalar_lea.hbm %s1723_s9, 32 }
 0x51e   :  { %p1443_p5 = scmp.ne.s32.totalorder %s1723_s9, %s1442_s22  ;;  %p1446_p6 = scmp.lt.u32.totalorder %s1442_s22, %s1723_s9 }
 0x520   :  { %p1448_p7 = pnand %p1446_p6, %p1443_p5 }
 0x522   :  { %1451 = shalt.err (!%p1448_p7)
}
 0x523   :  { %1101 = dma.vmem_to_hbm [thread:$0]  %s1099_s20, 32, %s1723_s9, [#allocation4]  }
 0x524   :  { %1452 = dma.done.wait [#allocation4], 32  }
 0x525   :  { %1453 = vsyncadd [#allocation4], 4294967264 }
 0x526   :  { %1105 = vsyncpa [#allocation4], 1 }

</bundles_post_ra>
